<compile_context>
chip_gen: v7x
topology: tpu7x:2x2x1
jax: 0.10.0
libtpu: 0.0.40
codegen_flags: <defaults>
</compile_context>

<pallas_src>
import jax
import jax.numpy as jnp
from jax.experimental import pallas as pl
from jax.experimental.pallas import tpu as pltpu


_VMEM_LIMIT_BYTES = 48 * 1024 * 1024   # explicit (> v5e's 16 MiB default, < v7x physical)
_SLAB_BUDGET_BYTES = 4 * 1024 * 1024   # per-step x slab budget (double-buffered by Pallas)


def _round_up(a, b):
    return -(-a // b) * b


def _num_tensorcores():
    try:
        dev = jax.devices()[0]
        for attr in ("num_cores", "core_count"):
            v = getattr(dev, attr, None)
            if isinstance(v, int) and v > 0:
                return v
    except Exception:
        pass
    return 1


# -----------------------------------------------------------------------------
# Fused weight/bias: (X W1^T + b1) W2^T + b2 == X Wf + bf
# Wf rows are ordered (k, c, i, j) to match the in-kernel patch rearrange.
# -----------------------------------------------------------------------------
def _fuse_params(params):
    w_proj = params["proj_w"]            # [E, Cin, pd, ph, pw] (PyTorch Conv3d layout)
    b_proj = params["proj_b"]            # [E]
    w_mix = params["mixer_w"]            # [E, E, 1, 1, 1]
    b_mix = params["mixer_b"]            # [E]
    E = w_proj.shape[0]
    K = w_proj.size // E
    w1t = jnp.transpose(w_proj.astype(jnp.float32), (4, 1, 2, 3, 0)).reshape(K, E)  # rows (k,c,i,j)
    w2t = w_mix.reshape(E, E).astype(jnp.float32).T                                  # [E, E]
    w_fused = (w1t @ w2t).astype(jnp.bfloat16)                                       # [K, E]
    b_fused = (b_proj.reshape(1, E).astype(jnp.float32) @ w2t
               + b_mix.reshape(1, E).astype(jnp.float32))                            # [1, E] f32
    return w_fused, b_fused


# -----------------------------------------------------------------------------
# Primary path: fused patchify + matmul kernel.
# Grid = (B, Dp, Hp//hc); each step handles hc*Wp patches.
# -----------------------------------------------------------------------------
def _make_fused_kernel(CI, hc, ph, Wp, pw):
    R = CI * ph  # = Cin*pd*ph

    def kernel(x_ref, w_ref, b_ref, o_ref):
        # x_ref: (1, Cin, pd, hc*ph, W)  input dtype
        # w_ref: (K, E) bf16 fused weight, rows ordered (k, c, i, j)
        # b_ref: (1, E) f32 fused bias
        # o_ref: (1, 1, hc*Wp, E)
        x = x_ref[...].astype(jnp.float32)        # do relayouts in f32 (robust path)
        x = x.reshape(CI, hc, ph, Wp * pw)        # merge (Cin,pd); split H->(hc,ph) (ph % 8 == 0)
        x = jnp.transpose(x, (1, 0, 2, 3))        # (hc, CI, ph, W): leading-dim permute
        x = x.reshape(hc, R, Wp * pw)             # merge (CI, ph) -> R
        x = jnp.swapaxes(x, 1, 2)                 # (hc, W, R): batched 2-D transpose
        xt = x.reshape(hc * Wp, pw * R)           # rows (h', w'); cols (k, c, i, j)
        acc = jnp.dot(xt.astype(jnp.bfloat16), w_ref[...],
                      preferred_element_type=jnp.float32)
        acc = acc + b_ref[...]
        o_ref[...] = acc.astype(o_ref.dtype).reshape(o_ref.shape)

    return kernel


def _choose_hc(Hp, Wp, per_hp_bytes, budget):
    """Largest hc (# of ph-rows per step) that fits the slab budget and keeps the
    output block layout-legal (hc*Wp % 8 == 0, or the full dim)."""
    if Hp * per_hp_bytes <= budget:
        return Hp
    for hc in range(Hp - 1, 0, -1):
        if Hp % hc:
            continue
        if hc * per_hp_bytes > budget:
            continue
        if (hc * Wp) % 8 == 0:
            return hc
    return Hp  # nothing fits AND is layout-legal: take the full slab (vmem_limit covers it)


def _patch_embed_fused(x, w_fused, b_fused, patch_size, out_dtype):
    B, Cin, D, H, W = x.shape
    pd, ph, pw = patch_size
    Dp, Hp, Wp = D // pd, H // ph, W // pw
    CI = Cin * pd
    K, E = w_fused.shape

    per_hp_bytes = Cin * pd * ph * W * x.dtype.itemsize
    hc = _choose_hc(Hp, Wp, per_hp_bytes, _SLAB_BUDGET_BYTES)
    grid = (B, Dp, Hp // hc)

    kernel = _make_fused_kernel(CI, hc, ph, Wp, pw)
    cost = pl.CostEstimate(
        flops=2 * B * Dp * Hp * Wp * K * E,
        transcendentals=0,
        bytes_accessed=int(x.size * x.dtype.itemsize + K * E * 2
                           + B * Dp * Hp * Wp * E * jnp.dtype(out_dtype).itemsize),
    )

    out = pl.pallas_call(
        kernel,
        out_shape=jax.ShapeDtypeStruct((B, Dp, Hp * Wp, E), out_dtype),
        grid_spec=pltpu.PrefetchScalarGridSpec(
            num_scalar_prefetch=0,
            grid=grid,
            in_specs=[
                pl.BlockSpec((1, Cin, pd, hc * ph, W), lambda b, d, h: (b, 0, d, h, 0)),
                pl.BlockSpec((K, E), lambda b, d, h: (0, 0)),   # fused weight (resident)
                pl.BlockSpec((1, E), lambda b, d, h: (0, 0)),   # fused bias
            ],
            out_specs=pl.BlockSpec((1, 1, hc * Wp, E), lambda b, d, h: (b, d, h, 0)),
        ),
        compiler_params=pltpu.CompilerParams(
            dimension_semantics=("parallel", "parallel", "parallel"),
            vmem_limit_bytes=_VMEM_LIMIT_BYTES,
        ),
        cost_estimate=cost,
    )(x, w_fused, b_fused)

    # 'b c d h w -> b (d h w) c': rows are already (d', h', w') row-major -> free reshape.
    return out.reshape(B, Dp * Hp * Wp, E)


# -----------------------------------------------------------------------------
# Fallback path: XLA patchify + plain fused-matmul kernel (no pad / no slice).
# -----------------------------------------------------------------------------
def _matmul_kernel(x_ref, w_ref, b_ref, o_ref):
    acc = jnp.dot(x_ref[...], w_ref[...], preferred_element_type=jnp.float32)
    o_ref[...] = (acc + b_ref[...]).astype(o_ref.dtype)


def _pick_tm(M, K, E, cores, max_tm=512):
    tm = max(16, min(max_tm, _round_up(M, 16)))
    # VMEM guard: double-buffered bf16 x tile + f32-ish out tile.
    cap = max(16, (_SLAB_BUDGET_BYTES * 2) // (4 * K + 8 * E))
    tm = min(tm, _round_up(cap, 16))
    if cores > 1 and M > 16:
        steps = -(-M // tm)
        if steps % cores != 0:           # keep every TensorCore busy on the last wave
            steps = _round_up(steps, cores)
            tm = max(16, min(tm, _round_up(-(-M // steps), 16)))
    return tm


def _patch_embed_unfused(x, w_fused, b_fused, patch_size, out_dtype):
    B, Cin, D, H, W = x.shape
    pd, ph, pw = patch_size
    Dp, Hp, Wp = D // pd, H // ph, W // pw
    N = Dp * Hp * Wp
    M = B * N
    K, E = w_fused.shape

    # bf16 first so the transpose moves half the bytes; columns ordered (k,c,i,j)
    # to match the fused weight row order.
    xp = x.astype(jnp.bfloat16).reshape(B, Cin, Dp, pd, Hp, ph, Wp, pw)
    xp = jnp.transpose(xp, (0, 2, 4, 6, 7, 1, 3, 5))
    x_patches = xp.reshape(M, K)

    tm = _pick_tm(M, K, E, _num_tensorcores())
    grid = (pl.cdiv(M, tm),)

    out = pl.pallas_call(
        _matmul_kernel,
        out_shape=jax.ShapeDtypeStruct((M, E), out_dtype),
        grid_spec=pltpu.PrefetchScalarGridSpec(
            num_scalar_prefetch=0,
            grid=grid,
            in_specs=[
                pl.BlockSpec((tm, K), lambda i: (i, 0)),
                pl.BlockSpec((K, E), lambda i: (0, 0)),
                pl.BlockSpec((1, E), lambda i: (0, 0)),
            ],
            out_specs=pl.BlockSpec((tm, E), lambda i: (i, 0)),
        ),
        compiler_params=pltpu.CompilerParams(
            dimension_semantics=("parallel",),
            vmem_limit_bytes=_VMEM_LIMIT_BYTES,
        ),
    )(x_patches, w_fused, b_fused)

    return out.reshape(B, N, E)


# -----------------------------------------------------------------------------
# PatchEmbed3D forward
# -----------------------------------------------------------------------------
_FUSED_PATCHIFY_OK = [None]  # None = untried, True/False after the first call


def patch_embed_3d(x, params, patch_size=(4, 16, 16), *, out_dtype=jnp.float32,
                   force_unfused=False):
    """x: [B, Cin, D, H, W].  Returns [B, N, embed_dim] (out_dtype)."""
    B, Cin, D, H, W = x.shape
    pd, ph, pw = patch_size
    assert D % pd == 0 and H % ph == 0 and W % pw == 0

    w_fused, b_fused = _fuse_params(params)

    if not force_unfused and _FUSED_PATCHIFY_OK[0] is not False:
        try:
            y = _patch_embed_fused(x, w_fused, b_fused, patch_size, out_dtype)
            if _FUSED_PATCHIFY_OK[0] is None:
                jax.block_until_ready(y)  # surface Mosaic lowering errors here (eager mode)
                _FUSED_PATCHIFY_OK[0] = True
            return y
        except Exception:
            # TODO(synk): drop this fallback once the in-kernel patch relayout
            # (reshape/transpose of the [Cin,pd,hc*ph,W] slab) lowers on all toolchains.
            _FUSED_PATCHIFY_OK[0] = False

    return _patch_embed_unfused(x, w_fused, b_fused, patch_size, out_dtype)


def init_params(key, in_channels=1, patch_size=(4, 16, 16), embed_dim=256):
    pd, ph, pw = patch_size
    k1, k2, k3, k4 = jax.random.split(key, 4)
    fan_in1 = in_channels * pd * ph * pw
    fan_in2 = embed_dim
    return {
        "proj_w": jax.random.normal(k1, (embed_dim, in_channels, pd, ph, pw),
                                    jnp.float32) * (1.0 / jnp.sqrt(fan_in1)),
        "proj_b": jax.random.normal(k2, (embed_dim,), jnp.float32) * 0.01,
        "mixer_w": jax.random.normal(k3, (embed_dim, embed_dim, 1, 1, 1),
                                     jnp.float32) * (1.0 / jnp.sqrt(fan_in2)),
        "mixer_b": jax.random.normal(k4, (embed_dim,), jnp.float32) * 0.01,
    }


def _reference(x, params, patch_size=(4, 16, 16)):
    """Pure-JAX reference (lax.conv_general_dilated, f32) for correctness check."""
    pd, ph, pw = patch_size
    h = jax.lax.conv_general_dilated(
        x, params["proj_w"], window_strides=(pd, ph, pw), padding="VALID",
        dimension_numbers=("NCDHW", "OIDHW", "NCDHW"))
    h = h + params["proj_b"][None, :, None, None, None]
    h = jax.lax.conv_general_dilated(
        h, params["mixer_w"], window_strides=(1, 1, 1), padding="VALID",
        dimension_numbers=("NCDHW", "OIDHW", "NCDHW"))
    h = h + params["mixer_b"][None, :, None, None, None]
    B, C = h.shape[0], h.shape[1]
    return jnp.transpose(h.reshape(B, C, -1), (0, 2, 1))   # b c d h w -> b (d h w) c


if __name__ == "__main__":
    key = jax.random.PRNGKey(0)
    kp, kx = jax.random.split(key)

    in_channels = 1
    patch_size = (4, 16, 16)
    embed_dim = 256
    # Small but non-trivial: N = 3*3*3 = 27 patches/batch, grid = (2, 3, 1).
    B, D, H, W = 2, 12, 48, 48

    params = init_params(kp, in_channels, patch_size, embed_dim)
    x = jax.random.normal(kx, (B, in_channels, D, H, W), jnp.float32)

    out = jax.block_until_ready(patch_embed_3d(x, params, patch_size))

    ref = _reference(x, params, patch_size)
    N = (D // patch_size[0]) * (H // patch_size[1]) * (W // patch_size[2])
    assert out.shape == (B, N, embed_dim), out.shape
    assert out.dtype == jnp.float32
    # bf16 matmul operands + algebraic weight fusion => looser tolerance than f32.
    assert jnp.allclose(out, ref, atol=5e-2, rtol=5e-2), (
        "mismatch vs reference, max abs diff = %f"
        % float(jnp.max(jnp.abs(out - ref))))

    # bf16-output variant (removes ~1/3 of the kernel's HBM write traffic).
    out_bf16 = jax.block_until_ready(
        patch_embed_3d(x, params, patch_size, out_dtype=jnp.bfloat16))
    assert out_bf16.dtype == jnp.bfloat16
    assert jnp.allclose(out_bf16.astype(jnp.float32), ref, atol=1e-1, rtol=1e-1)

    print("KERNEL_OK")
</pallas_src>

<mosaic_0001>
module attributes {stable_mosaic.version = 11 : i64} {
  func.func @kernel(%arg0: i32, %arg1: i32, %arg2: i32, %arg3: memref<1x1x4x48x48xf32, #tpu.memory_space<vmem>>, %arg4: memref<1024x256xbf16, #tpu.memory_space<vmem>>, %arg5: memref<1x256xf32, #tpu.memory_space<vmem>>, %arg6: memref<1x1x9x256xf32, #tpu.memory_space<vmem>>) attributes {dimension_semantics = [#tpu.dimension_semantics<parallel>, #tpu.dimension_semantics<parallel>, #tpu.dimension_semantics<parallel>], iteration_bounds = array<i64: 2, 3, 1>, scalar_prefetch = 0 : i64, scratch_operands = 0 : i64, tpu.core_type = #tpu.core_type<tc>, window_params = [{transform_indices = @transform_0, window_bounds = array<i64: 1, 1, 4, 48, 48>}, {pipeline_mode = #tpu.pipeline_mode<synchronous>, transform_indices = @transform_1, window_bounds = array<i64: 1024, 256>}, {pipeline_mode = #tpu.pipeline_mode<synchronous>, transform_indices = @transform_2, window_bounds = array<i64: 1, 256>}, {transform_indices = @transform_3, window_bounds = array<i64: 1, 1, 9, 256>}]} {
    %c0 = arith.constant 0 : index
    %c0_0 = arith.constant 0 : index
    %c0_1 = arith.constant 0 : index
    %c0_2 = arith.constant 0 : index
    %c0_3 = arith.constant 0 : index
    %0 = vector.load %arg3[%c0, %c0_0, %c0_1, %c0_2, %c0_3] : memref<1x1x4x48x48xf32, #tpu.memory_space<vmem>>, vector<1x1x4x48x48xf32>
    %1 = vector.shape_cast %0 : vector<1x1x4x48x48xf32> to vector<4x3x16x48xf32>
    %2 = tpu.transpose %1, [1, 0, 2, 3] : vector<4x3x16x48xf32> -> vector<3x4x16x48xf32>
    %3 = vector.shape_cast %2 : vector<3x4x16x48xf32> to vector<3x64x48xf32>
    %4 = tpu.transpose %3, [0, 2, 1] : vector<3x64x48xf32> -> vector<3x48x64xf32>
    %5 = vector.shape_cast %4 : vector<3x48x64xf32> to vector<9x1024xf32>
    %6 = arith.truncf %5 : vector<9x1024xf32> to vector<9x1024xbf16>
    %c0_4 = arith.constant 0 : index
    %c0_5 = arith.constant 0 : index
    %7 = vector.load %arg4[%c0_4, %c0_5] : memref<1024x256xbf16, #tpu.memory_space<vmem>>, vector<1024x256xbf16>
    %cst = arith.constant dense<0.000000e+00> : vector<9x256xf32>
    %8 = tpu.matmul %6, %7, %cst {dimension_numbers = #tpu.dot_dimension_numbers<[1], [0], [0], [1], [0, 0, 1, 1], [], []>} : vector<9x1024xbf16>, vector<1024x256xbf16>, vector<9x256xf32> -> vector<9x256xf32>
    %c0_6 = arith.constant 0 : index
    %c0_7 = arith.constant 0 : index
    %9 = vector.load %arg5[%c0_6, %c0_7] : memref<1x256xf32, #tpu.memory_space<vmem>>, vector<1x256xf32>
    %10 = vector.broadcast %9 : vector<1x256xf32> to vector<9x256xf32>
    %11 = arith.addf %8, %10 : vector<9x256xf32>
    %12 = vector.shape_cast %11 : vector<9x256xf32> to vector<1x1x9x256xf32>
    %c0_8 = arith.constant 0 : index
    %c0_9 = arith.constant 0 : index
    %c0_10 = arith.constant 0 : index
    %c0_11 = arith.constant 0 : index
    %13 = vector.load %arg6[%c0_8, %c0_9, %c0_10, %c0_11] : memref<1x1x9x256xf32, #tpu.memory_space<vmem>>, vector<1x1x9x256xf32>
    tpu.vector_store %arg6[%c0_8, %c0_9, %c0_10, %c0_11], %12 {strides = array<i32>} : memref<1x1x9x256xf32, #tpu.memory_space<vmem>>, vector<1x1x9x256xf32>,
    return
  }
  func.func @transform_0(%arg0: i32, %arg1: i32, %arg2: i32) -> (i32, i32, i32, i32, i32) {
    %c0_i32 = arith.constant 0 : i32
    %c0_i32_0 = arith.constant 0 : i32
    %c0_i32_1 = arith.constant 0 : i32
    return %arg0, %c0_i32, %arg1, %arg2, %c0_i32_0 : i32, i32, i32, i32, i32
  }
  func.func @transform_1(%arg0: i32, %arg1: i32, %arg2: i32) -> (i32, i32) {
    %c0_i32 = arith.constant 0 : i32
    %c0_i32_0 = arith.constant 0 : i32
    %c0_i32_1 = arith.constant 0 : i32
    return %c0_i32, %c0_i32_0 : i32, i32
  }
  func.func @transform_2(%arg0: i32, %arg1: i32, %arg2: i32) -> (i32, i32) {
    %c0_i32 = arith.constant 0 : i32
    %c0_i32_0 = arith.constant 0 : i32
    %c0_i32_1 = arith.constant 0 : i32
    return %c0_i32, %c0_i32_0 : i32, i32
  }
  func.func @transform_3(%arg0: i32, %arg1: i32, %arg2: i32) -> (i32, i32, i32, i32) {
    %c0_i32 = arith.constant 0 : i32
    %c0_i32_0 = arith.constant 0 : i32
    return %arg0, %arg1, %arg2, %c0_i32 : i32, i32, i32, i32
  }
}

module attributes {stable_mosaic.version = 11 : i64} {
  func.func @_matmul_kernel(%arg0: i32, %arg1: memref<64x1024xbf16, #tpu.memory_space<vmem>>, %arg2: memref<1024x256xbf16, #tpu.memory_space<vmem>>, %arg3: memref<1x256xf32, #tpu.memory_space<vmem>>, %arg4: memref<64x256xf32, #tpu.memory_space<vmem>>) attributes {dimension_semantics = [#tpu.dimension_semantics<parallel>], iteration_bounds = array<i64: 1>, scalar_prefetch = 0 : i64, scratch_operands = 0 : i64, tpu.core_type = #tpu.core_type<tc>, window_params = [{transform_indices = @transform_0, window_bounds = array<i64: 64, 1024>}, {pipeline_mode = #tpu.pipeline_mode<synchronous>, transform_indices = @transform_1, window_bounds = array<i64: 1024, 256>}, {pipeline_mode = #tpu.pipeline_mode<synchronous>, transform_indices = @transform_2, window_bounds = array<i64: 1, 256>}, {transform_indices = @transform_3, window_bounds = array<i64: 64, 256>}]} {
    %c0 = arith.constant 0 : index
    %c0_0 = arith.constant 0 : index
    %0 = vector.load %arg1[%c0, %c0_0] : memref<64x1024xbf16, #tpu.memory_space<vmem>>, vector<64x1024xbf16>
    %c0_1 = arith.constant 0 : index
    %c0_2 = arith.constant 0 : index
    %1 = vector.load %arg2[%c0_1, %c0_2] : memref<1024x256xbf16, #tpu.memory_space<vmem>>, vector<1024x256xbf16>
    %cst = arith.constant dense<0.000000e+00> : vector<64x256xf32>
    %2 = tpu.matmul %0, %1, %cst {dimension_numbers = #tpu.dot_dimension_numbers<[1], [0], [0], [1], [0, 0, 1, 1], [], []>} : vector<64x1024xbf16>, vector<1024x256xbf16>, vector<64x256xf32> -> vector<64x256xf32>
    %c0_3 = arith.constant 0 : index
    %c0_4 = arith.constant 0 : index
    %3 = vector.load %arg3[%c0_3, %c0_4] : memref<1x256xf32, #tpu.memory_space<vmem>>, vector<1x256xf32>
    %4 = vector.broadcast %3 : vector<1x256xf32> to vector<64x256xf32>
    %5 = arith.addf %2, %4 : vector<64x256xf32>
    %c0_5 = arith.constant 0 : index
    %c0_6 = arith.constant 0 : index
    %6 = vector.load %arg4[%c0_5, %c0_6] : memref<64x256xf32, #tpu.memory_space<vmem>>, vector<64x256xf32>
    tpu.vector_store %arg4[%c0_5, %c0_6], %5 {strides = array<i32>} : memref<64x256xf32, #tpu.memory_space<vmem>>, vector<64x256xf32>,
    return
  }
  func.func @transform_0(%arg0: i32) -> (i32, i32) {
    %c0_i32 = arith.constant 0 : i32
    %c0_i32_0 = arith.constant 0 : i32
    return %arg0, %c0_i32 : i32, i32
  }
  func.func @transform_1(%arg0: i32) -> (i32, i32) {
    %c0_i32 = arith.constant 0 : i32
    %c0_i32_0 = arith.constant 0 : i32
    %c0_i32_1 = arith.constant 0 : i32
    return %c0_i32, %c0_i32_0 : i32, i32
  }
  func.func @transform_2(%arg0: i32) -> (i32, i32) {
    %c0_i32 = arith.constant 0 : i32
    %c0_i32_0 = arith.constant 0 : i32
    %c0_i32_1 = arith.constant 0 : i32
    return %c0_i32, %c0_i32_0 : i32, i32
  }
  func.func @transform_3(%arg0: i32) -> (i32, i32) {
    %c0_i32 = arith.constant 0 : i32
    %c0_i32_0 = arith.constant 0 : i32
    return %arg0, %c0_i32 : i32, i32
  }
}

</mosaic_0001>

<bundles_post_ra>
// kernel: tpu_custom_call.1
= control target key start
LH: loop header
LB: loop body
LE: loop exit
PB: predicated region body
PF: predicated region fallthrough
CT: control target
= control target key end

     0   :  { %8 = vsyncpa [#allocation3], 0  ;;  %s1942_s0 = inlined_call_operand.hbm [shape: bf16[54,1024], index: 0, kind: input, shape index: {}]   ;;  %s1943_s1 = inlined_call_operand.hbm [shape: bf16[1024,256], index: 1, kind: input, shape index: {}]   ;;  %s1944_s2 = inlined_call_operand.vmem [shape: f32[1,256], index: 2, kind: input, shape index: {}]   ;;  %s1945_s3 = inlined_call_operand.hbm [shape: f32[54,256], index: 3, kind: output, shape index: {}]  }
   0x1   :  { %9 = vsyncpa [#allocation6], 0 }
   0x2   :  { %10 = vsyncpa [#allocation4], 0 }
   0x3   :  { %15 = vsyncadd [#allocation3], 512  ;;  %s1838_s12 = smov [#allocation2]   ;;  %s1766_s16 = scalar_lea.hbm %s1942_s0, 3584 }
   0x4   :  { %s16_s13 = sshll.u32 %s1838_s12, 4  ;;  %p1767_p0 = scmp.ne.s32.totalorder %s1942_s0, %s1766_s16  ;;  %s17_s13 = int_to_ptr.vmem [resolvable:$true] %s16_s13 }
   0x5   :  { %p1770_p1 = scmp.lt.u32.totalorder %s1766_s16, %s1942_s0 }
   0x7   :  { %p1772_p2 = pnand %p1770_p1, %p1767_p0 }
   0x9   :  { %1775 = shalt.err (!%p1772_p2)
}
   0xa   :  { %s1776_s21 = scalar_lea.vmem %s17_s13, 3584  ;;  %s1780_s22 = scalar_lea.vmem %s17_s13, 4096 }
   0xb   :  { %p1777_p3 = scmp.ne.s32.totalorder %s17_s13, %s1776_s21  ;;  %p1781_p4 = scmp.lt.s32.totalorder %s17_s13, %s17_s13 }
   0xc   :  { %p1782_p5 = scmp.lt.s32.totalorder %s1780_s22, %s1776_s21 }
   0xe   :  { %p1783_p6 = por %p1782_p5, %p1781_p4 }
  0x10   :  { %p1784_p7 = pnand %p1783_p6, %p1777_p3 }
  0x12   :  { %1787 = shalt.err (!%p1784_p7)
}
  0x13   :  { %s1839_s23 = smov 512   ;;  %s1840_s24 = smov 32  }
  0x14   :  { %22 = dma.hbm_to_vmem [thread:$0]  %s1942_s0, 3584, %s17_s13, [#allocation3], %s1839_s23, %s1839_s23, %s1840_s24  }
  0x15   :  { %s1841_s27 = smov [#allocation5]   ;;  %s1788_s4 = scalar_lea.hbm %s1943_s1, 16384 }
  0x16   :  { %s28_s28 = sshll.u32 %s1841_s27, 4  ;;  %p1789_p8 = scmp.ne.s32.totalorder %s1943_s1, %s1788_s4  ;;  %s29_s28 = int_to_ptr.vmem [resolvable:$true] %s28_s28 }
  0x17   :  { %p1792_p9 = scmp.lt.u32.totalorder %s1788_s4, %s1943_s1 }
  0x19   :  { %p1794_p10 = pnand %p1792_p9, %p1789_p8 }
  0x1b   :  { %1797 = shalt.err (!%p1794_p10)
}
  0x1c   :  { %s1798_s9 = scalar_lea.vmem %s29_s28, 16384  ;;  %p1803_p12 = scmp.lt.s32.totalorder %s29_s28, %s29_s28 }
  0x1d   :  { %p1799_p11 = scmp.ne.s32.totalorder %s29_s28, %s1798_s9  ;;  %p1804_p13 = scmp.lt.s32.totalorder %s1798_s9, %s1798_s9 }
  0x1f   :  { %p1805_p0 = por %p1804_p13, %p1803_p12 }
  0x21   :  { %p1806_p1 = pnand %p1805_p0, %p1799_p11 }
  0x23   :  { %1809 = shalt.err (!%p1806_p1)
}
  0x24   :  { %s1842_s0 = smov 128   ;;  %s1843_s10 = smov 8  }
  0x25   :  { %34 = dma.hbm_to_vmem [thread:$0]  %s1943_s1, 16384, %s29_s28, [#allocation6], %s1842_s0, %s1842_s0, %s1843_s10  }
  0x26   :  { %1832 = dma.done.wait [#allocation3], 4096  }
  0x27   :  { %1833 = vsyncadd [#allocation3], 4294963200 }
  0x28   :  { %1834 = dma.done.wait [#allocation6], 16384  }
  0x29   :  { %1835 = vsyncadd [#allocation6], 4294950912  ;;  %v1574_v0 = vld [vmem:[#allocation5 + $0x4] ss:$8 sps:$4 sm:$0xff]   ;;  %v1578_v2 = vld [vmem:[#allocation5] ss:$8 sps:$4 sm:$0xff]  }
  0x2a   :  { %v1576_v1 = vld [vmem:[#allocation5 + $0x204] ss:$8 sps:$4 sm:$0xff]   ;;  %1015 = vmatprep.subr.bf16.mxu1 %v1574_v0  ;;  %v1579_v3 = vld [vmem:[#allocation5 + $0x200] ss:$8 sps:$4 sm:$0xff]   ;;  %v1580_v4 = vld [vmem:[#allocation5 + $0x14] ss:$8 sps:$4 sm:$0xff]  }
  0x2b   :  { %1161 = vmatprep.subr.bf16.mxu0 %v1576_v1  ;;  %1016 = vmatpush1.bf16.msra.mxu1 %v1578_v2  ;;  %v1582_v5 = vld [vmem:[#allocation5 + $0x214] ss:$8 sps:$4 sm:$0xff]   ;;  %v1584_v6 = vld [vmem:[#allocation5 + $0x10] ss:$8 sps:$4 sm:$0xff]   ;;  %v1586_v8 = vld [vmem:[#allocation5 + $0x24] ss:$8 sps:$4 sm:$0xff]  }
  0x2c   :  { %1162 = vmatpush1.bf16.msra.mxu0 %v1579_v3  ;;  %1017 = vmatprep.subr.bf16.mxu1 %v1580_v4  ;;  %v1585_v7 = vld [vmem:[#allocation5 + $0x210] ss:$8 sps:$4 sm:$0xff]   ;;  %v1588_v9 = vld [vmem:[#allocation5 + $0x224] ss:$8 sps:$4 sm:$0xff]   ;;  %v1590_v10 = vld [vmem:[#allocation5 + $0x20] ss:$8 sps:$4 sm:$0xff]  }
  0x2d   :  { %1163 = vmatprep.subr.bf16.mxu0 %v1582_v5  ;;  %v1591_v11 = vld [vmem:[#allocation5 + $0x220] ss:$8 sps:$4 sm:$0xff]   ;;  %v1592_v12 = vld [vmem:[#allocation5 + $0x34] ss:$8 sps:$4 sm:$0xff]   ;;  %v1596_v14 = vld [vmem:[#allocation5 + $0x30] ss:$8 sps:$4 sm:$0xff]  }
  0x2e   :  { %v1594_v13 = vld [vmem:[#allocation5 + $0x234] ss:$8 sps:$4 sm:$0xff]   ;;  %v1597_v15 = vld [vmem:[#allocation5 + $0x230] ss:$8 sps:$4 sm:$0xff]   ;;  %v1598_v16 = vld [vmem:[#allocation5 + $0x44] ss:$8 sps:$4 sm:$0xff]  }
  0x2f   :  { %1018 = vmatpush1.bf16.msra.mxu1 %v1584_v6  ;;  %v1600_v17 = vld [vmem:[#allocation5 + $0x244] ss:$8 sps:$4 sm:$0xff]   ;;  %v1602_v18 = vld [vmem:[#allocation5 + $0x40] ss:$8 sps:$4 sm:$0xff]   ;;  %v1604_v20 = vld [vmem:[#allocation5 + $0x54] ss:$8 sps:$4 sm:$0xff]  }
  0x30   :  { %1164 = vmatpush1.bf16.msra.mxu0 %v1585_v7  ;;  %1019 = vmatprep.subr.bf16.mxu1 %v1586_v8  ;;  %v1603_v19 = vld [vmem:[#allocation5 + $0x240] ss:$8 sps:$4 sm:$0xff]   ;;  %v1606_v21 = vld [vmem:[#allocation5 + $0x254] ss:$8 sps:$4 sm:$0xff]   ;;  %v1608_v22 = vld [vmem:[#allocation5 + $0x50] ss:$8 sps:$4 sm:$0xff]  }
  0x31   :  { %1165 = vmatprep.subr.bf16.mxu0 %v1588_v9  ;;  %v1609_v23 = vld [vmem:[#allocation5 + $0x250] ss:$8 sps:$4 sm:$0xff]   ;;  %v1610_v24 = vld [vmem:[#allocation5 + $0x64] ss:$8 sps:$4 sm:$0xff]   ;;  %v1614_v26 = vld [vmem:[#allocation5 + $0x60] ss:$8 sps:$4 sm:$0xff]  }
  0x32   :  { %v1612_v25 = vld [vmem:[#allocation5 + $0x264] ss:$8 sps:$4 sm:$0xff]   ;;  %v1615_v27 = vld [vmem:[#allocation5 + $0x260] ss:$8 sps:$4 sm:$0xff]   ;;  %v1616_v28 = vld [vmem:[#allocation5 + $0x74] ss:$8 sps:$4 sm:$0xff]  }
  0x33   :  { %1020 = vmatpush1.bf16.msra.mxu1 %v1590_v10  ;;  %v1618_v29 = vld [vmem:[#allocation5 + $0x274] ss:$8 sps:$4 sm:$0xff]   ;;  %v1620_v30 = vld [vmem:[#allocation5 + $0x70] ss:$8 sps:$4 sm:$0xff]   ;;  %v1622_v32 = vld [vmem:[#allocation5 + $0x84] ss:$8 sps:$4 sm:$0xff]  }
  0x34   :  { %1166 = vmatpush1.bf16.msra.mxu0 %v1591_v11  ;;  %1021 = vmatprep.subr.bf16.mxu1 %v1592_v12  ;;  %v1621_v31 = vld [vmem:[#allocation5 + $0x270] ss:$8 sps:$4 sm:$0xff]   ;;  %v1624_v33 = vld [vmem:[#allocation5 + $0x284] ss:$8 sps:$4 sm:$0xff]   ;;  %v1626_v34 = vld [vmem:[#allocation5 + $0x80] ss:$8 sps:$4 sm:$0xff]  }
  0x35   :  { %1167 = vmatprep.subr.bf16.mxu0 %v1594_v13  ;;  %v1627_v35 = vld [vmem:[#allocation5 + $0x280] ss:$8 sps:$4 sm:$0xff]   ;;  %v1628_v36 = vld [vmem:[#allocation5 + $0x94] ss:$8 sps:$4 sm:$0xff]   ;;  %v1632_v38 = vld [vmem:[#allocation5 + $0x90] ss:$8 sps:$4 sm:$0xff]  }
  0x36   :  { %v1630_v37 = vld [vmem:[#allocation5 + $0x294] ss:$8 sps:$4 sm:$0xff]   ;;  %v1633_v39 = vld [vmem:[#allocation5 + $0x290] ss:$8 sps:$4 sm:$0xff]   ;;  %v1634_v40 = vld [vmem:[#allocation5 + $0xa4] ss:$8 sps:$4 sm:$0xff]  }
  0x37   :  { %1022 = vmatpush1.bf16.msra.mxu1 %v1596_v14  ;;  %v1636_v41 = vld [vmem:[#allocation5 + $0x2a4] ss:$8 sps:$4 sm:$0xff]   ;;  %v1638_v42 = vld [vmem:[#allocation5 + $0xa0] ss:$8 sps:$4 sm:$0xff]   ;;  %v1640_v44 = vld [vmem:[#allocation5 + $0xb4] ss:$8 sps:$4 sm:$0xff]  }
  0x38   :  { %1168 = vmatpush1.bf16.msra.mxu0 %v1597_v15  ;;  %1023 = vmatprep.subr.bf16.mxu1 %v1598_v16  ;;  %v1639_v43 = vld [vmem:[#allocation5 + $0x2a0] ss:$8 sps:$4 sm:$0xff]   ;;  %v1642_v45 = vld [vmem:[#allocation5 + $0x2b4] ss:$8 sps:$4 sm:$0xff]   ;;  %v1644_v46 = vld [vmem:[#allocation5 + $0xb0] ss:$8 sps:$4 sm:$0xff]  }
  0x39   :  { %1169 = vmatprep.subr.bf16.mxu0 %v1600_v17  ;;  %v1645_v47 = vld [vmem:[#allocation5 + $0x2b0] ss:$8 sps:$4 sm:$0xff]   ;;  %v43_v48 = vld [vmem:[#allocation2] sm:$0xff]  ;;  %v1652_v58 = vld [vmem:[#allocation5 + $0xd4] ss:$8 sps:$4 sm:$0xff]  }
  0x3a   :  { %v47_v49 = vld [vmem:[#allocation2 + $0x20] sm:$0xff]  ;;  %v45_v53 = vld [vmem:[#allocation2 + $0x10] sm:$0xff] }
  0x3b   :  { %1024 = vmatpush1.bf16.msra.mxu1 %v1602_v18  ;;  %v1646_v50 = vld [vmem:[#allocation5 + $0xc4] ss:$8 sps:$4 sm:$0xff]   ;;  %v1342_v52 = vcombine.high %v43_v48, %v47_v49  ;;  %v49_v54 = vld [vmem:[#allocation2 + $0x30] sm:$0xff]  ;;  %v1650_v56 = vld [vmem:[#allocation5 + $0xc0] ss:$8 sps:$4 sm:$0xff]   ;;  %v1341_v8 = vcombine.low %v43_v48, %v47_v49 }
  0x3c   :  { %1170 = vmatpush1.bf16.msra.mxu0 %v1603_v19  ;;  %1025 = vmatprep.subr.bf16.mxu1 %v1604_v20  ;;  %v1648_v51 = vld [vmem:[#allocation5 + $0x2c4] ss:$8 sps:$4 sm:$0xff]   ;;  %v1346_v55 = vcombine.high %v45_v53, %v49_v54  ;;  %v1651_v57 = vld [vmem:[#allocation5 + $0x2c0] ss:$8 sps:$4 sm:$0xff]   ;;  %v1654_v59 = vld [vmem:[#allocation5 + $0x2d4] ss:$8 sps:$4 sm:$0xff]   ;;  %v1345_v10 = vcombine.low %v45_v53, %v49_v54 }
  0x3d   :  { %1171 = vmatprep.subr.bf16.mxu0 %v1606_v21  ;;  %1047 = vmatprep.mubr.bf16.mxu1 %v1342_v52  ;;  %v1656_v60 = vld [vmem:[#allocation5 + $0xd0] ss:$8 sps:$4 sm:$0xff]   ;;  %v1658_v62 = vld [vmem:[#allocation5 + $0xe4] ss:$8 sps:$4 sm:$0xff]   ;;  %v1662_v0 = vld [vmem:[#allocation5 + $0xe0] ss:$8 sps:$4 sm:$0xff]  }
  0x3e   :  { %1193 = vmatprep.mubr.bf16.mxu0 %v1346_v55  ;;  %v1657_v61 = vld [vmem:[#allocation5 + $0x2d0] ss:$8 sps:$4 sm:$0xff]   ;;  %v1660_v63 = vld [vmem:[#allocation5 + $0x2e4] ss:$8 sps:$4 sm:$0xff]   ;;  %v1663_v1 = vld [vmem:[#allocation5 + $0x2e0] ss:$8 sps:$4 sm:$0xff]  }
  0x3f   :  { %1026 = vmatpush1.bf16.msra.mxu1 %v1608_v22  ;;  %v1664_v2 = vld [vmem:[#allocation5 + $0xf4] ss:$8 sps:$4 sm:$0xff]   ;;  %v1668_v4 = vld [vmem:[#allocation5 + $0xf0] ss:$8 sps:$4 sm:$0xff]   ;;  %v1672_v6 = vld [vmem:[#allocation5 + $0x104] ss:$8 sps:$4 sm:$0xff]  }
  0x40   :  { %1172 = vmatpush1.bf16.msra.mxu0 %v1609_v23  ;;  %1027 = vmatprep.subr.bf16.mxu1 %v1610_v24  ;;  %v1666_v3 = vld [vmem:[#allocation5 + $0x2f4] ss:$8 sps:$4 sm:$0xff]   ;;  %v1669_v5 = vld [vmem:[#allocation5 + $0x2f0] ss:$8 sps:$4 sm:$0xff]   ;;  %v1675_v7 = vld [vmem:[#allocation5 + $0x304] ss:$8 sps:$4 sm:$0xff]  }
  0x41   :  { %1173 = vmatprep.subr.bf16.mxu0 %v1612_v25  ;;  %v1670_v9 = vld [vmem:[#allocation5 + $0x100] ss:$8 sps:$4 sm:$0xff]   ;;  %v1678_v12 = vld [vmem:[#allocation5 + $0x114] ss:$8 sps:$4 sm:$0xff]   ;;  %v1676_v14 = vld [vmem:[#allocation5 + $0x110] ss:$8 sps:$4 sm:$0xff]  }
  0x42   :  { %v1673_v11 = vld [vmem:[#allocation5 + $0x300] ss:$8 sps:$4 sm:$0xff]   ;;  %v1681_v13 = vld [vmem:[#allocation5 + $0x314] ss:$8 sps:$4 sm:$0xff]   ;;  %v1679_v15 = vld [vmem:[#allocation5 + $0x310] ss:$8 sps:$4 sm:$0xff]  }
  0x43   :  { %1028 = vmatpush1.bf16.msra.mxu1 %v1614_v26  ;;  %v1684_v16 = vld [vmem:[#allocation5 + $0x124] ss:$8 sps:$4 sm:$0xff]   ;;  %v1682_v18 = vld [vmem:[#allocation5 + $0x120] ss:$8 sps:$4 sm:$0xff]   ;;  %v53_v22 = vld [vmem:[#allocation2 + $0x50] sm:$0xff] }
  0x44   :  { %1174 = vmatpush1.bf16.msra.mxu0 %v1615_v27  ;;  %1029 = vmatprep.subr.bf16.mxu1 %v1616_v28  ;;  %v1687_v17 = vld [vmem:[#allocation5 + $0x324] ss:$8 sps:$4 sm:$0xff]   ;;  %v1685_v19 = vld [vmem:[#allocation5 + $0x320] ss:$8 sps:$4 sm:$0xff]   ;;  %v57_v23 = vld [vmem:[#allocation2 + $0x70] sm:$0xff] }
  0x45   :  { %1175 = vmatprep.subr.bf16.mxu0 %v1618_v29  ;;  %v51_v20 = vld [vmem:[#allocation2 + $0x40] sm:$0xff]  ;;  %v1690_v24 = vld [vmem:[#allocation5 + $0x134] ss:$8 sps:$4 sm:$0xff]   ;;  %v1354_v26 = vcombine.high %v53_v22, %v57_v23  ;;  %v1353_v29 = vcombine.low %v53_v22, %v57_v23 }
  0x46   :  { %v55_v21 = vld [vmem:[#allocation2 + $0x60] sm:$0xff]  ;;  %v1693_v28 = vld [vmem:[#allocation5 + $0x334] ss:$8 sps:$4 sm:$0xff]  }
  0x47   :  { %1030 = vmatpush1.bf16.msra.mxu1 %v1620_v30  ;;  %v1350_v25 = vcombine.high %v51_v20, %v55_v21  ;;  %v1349_v27 = vcombine.low %v51_v20, %v55_v21  ;;  %v1688_v30 = vld [vmem:[#allocation5 + $0x130] ss:$8 sps:$4 sm:$0xff]   ;;  %v1708_v48 = vld [vmem:[#allocation5 + $0x164] ss:$8 sps:$4 sm:$0xff]  }
  0x48   :  { %1176 = vmatpush1.bf16.msra.mxu0 %v1621_v31  ;;  %1031 = vmatprep.subr.bf16.mxu1 %v1622_v32  ;;  %v1691_v31 = vld [vmem:[#allocation5 + $0x330] ss:$8 sps:$4 sm:$0xff]   ;;  %v1696_v32 = vld [vmem:[#allocation5 + $0x144] ss:$8 sps:$4 sm:$0xff]  }
  0x49   :  { %1177 = vmatprep.subr.bf16.mxu0 %v1624_v33  ;;  %v1699_v33 = vld [vmem:[#allocation5 + $0x344] ss:$8 sps:$4 sm:$0xff]   ;;  %v69_v52 = vld [vmem:[#allocation2 + $0xd0] sm:$0xff] }
  0x4a   :  { %v1711_v49 = vld [vmem:[#allocation5 + $0x364] ss:$8 sps:$4 sm:$0xff]   ;;  %v73_v54 = vld [vmem:[#allocation2 + $0xf0] sm:$0xff] }
  0x4b   :  { %1032 = vmatpush1.bf16.msra.mxu1 %v1626_v34  ;;  %v59_v34 = vld [vmem:[#allocation2 + $0x80] sm:$0xff]  ;;  %v1370_v55 = vcombine.high %v69_v52, %v73_v54  ;;  %v1736_v20 = vld [vmem:[#allocation5 + $0x1b0] ss:$8 sps:$4 sm:$0xff]  }
  0x4c   :  { %1178 = vmatpush1.bf16.msra.mxu0 %v1627_v35  ;;  %1033 = vmatprep.subr.bf16.mxu1 %v1628_v36  ;;  %v63_v35 = vld [vmem:[#allocation2 + $0xa0] sm:$0xff]  ;;  %v1739_v21 = vld [vmem:[#allocation5 + $0x3b0] ss:$8 sps:$4 sm:$0xff]  }
  0x4d   :  { %1179 = vmatprep.subr.bf16.mxu0 %v1630_v37  ;;  %v1358_v36 = vcombine.high %v59_v34, %v63_v35  ;;  %v61_v37 = vld [vmem:[#allocation2 + $0x90] sm:$0xff]  ;;  %v1744_v22 = vld [vmem:[#allocation5 + $0x1c4] ss:$8 sps:$4 sm:$0xff]  }
  0x4e   :  { %v1747_v23 = vld [vmem:[#allocation5 + $0x3c4] ss:$8 sps:$4 sm:$0xff]  }
  0x4f   :  { %1034 = vmatpush1.bf16.msra.mxu1 %v1632_v38  ;;  %v65_v38 = vld [vmem:[#allocation2 + $0xb0] sm:$0xff] }
  0x50   :  { %1180 = vmatpush1.bf16.msra.mxu0 %v1633_v39  ;;  %1035 = vmatprep.subr.bf16.mxu1 %v1634_v40  ;;  %v1694_v39 = vld [vmem:[#allocation5 + $0x140] ss:$8 sps:$4 sm:$0xff]  }
  0x51   :  { %1181 = vmatprep.subr.bf16.mxu0 %v1636_v41  ;;  %v1697_v40 = vld [vmem:[#allocation5 + $0x340] ss:$8 sps:$4 sm:$0xff]   ;;  %v1362_v41 = vcombine.high %v61_v37, %v65_v38 }
  0x53   :  { %1036 = vmatpush1.bf16.msra.mxu1 %v1638_v42  ;;  %v1357_v42 = vcombine.low %v59_v34, %v63_v35  ;;  %v1762_v34 = vld [vmem:[#allocation5 + $0x1f4] ss:$8 sps:$4 sm:$0xff]  }
  0x54   :  { %1182 = vmatpush1.bf16.msra.mxu0 %v1639_v43  ;;  %1037 = vmatprep.subr.bf16.mxu1 %v1640_v44  ;;  %v1361_v43 = vcombine.low %v61_v37, %v65_v38  ;;  %v1702_v44 = vld [vmem:[#allocation5 + $0x154] ss:$8 sps:$4 sm:$0xff]   ;;  %v1763_v37 = vld [vmem:[#allocation5 + $0x3f0] ss:$8 sps:$4 sm:$0xff]   ;;  %v52_v38 = vld [vmem:[#allocation2 + $0x48] sm:$0xff] }
  0x55   :  { %1183 = vmatprep.subr.bf16.mxu0 %v1642_v45  ;;  %v1705_v45 = vld [vmem:[#allocation5 + $0x354] ss:$8 sps:$4 sm:$0xff]  }
  0x56   :  { %v1765_v35 = vld [vmem:[#allocation5 + $0x3f4] ss:$8 sps:$4 sm:$0xff]  }
  0x57   :  { %1038 = vmatpush1.bf16.msra.mxu1 %v1644_v46  ;;  %v1700_v46 = vld [vmem:[#allocation5 + $0x150] ss:$8 sps:$4 sm:$0xff]  }
  0x58   :  { %1184 = vmatpush1.bf16.msra.mxu0 %v1645_v47  ;;  %1039 = vmatprep.subr.bf16.mxu1 %v1646_v50  ;;  %v1703_v47 = vld [vmem:[#allocation5 + $0x350] ss:$8 sps:$4 sm:$0xff]   ;;  %v67_v50 = vld [vmem:[#allocation2 + $0xc0] sm:$0xff] }
  0x59   :  { %1185 = vmatprep.subr.bf16.mxu0 %v1648_v51  ;;  %v71_v51 = vld [vmem:[#allocation2 + $0xe0] sm:$0xff] }
  0x5a   :  { %v1366_v53 = vcombine.high %v67_v50, %v71_v51 }
  0x5b   :  { %1040 = vmatpush1.bf16.msra.mxu1 %v1650_v56  ;;  %v1706_v56 = vld [vmem:[#allocation5 + $0x160] ss:$8 sps:$4 sm:$0xff]  }
  0x5c   :  { %1186 = vmatpush1.bf16.msra.mxu0 %v1651_v57  ;;  %1041 = vmatprep.subr.bf16.mxu1 %v1652_v58  ;;  %v1709_v57 = vld [vmem:[#allocation5 + $0x360] ss:$8 sps:$4 sm:$0xff]   ;;  %v1365_v58 = vcombine.low %v67_v50, %v71_v51 }
  0x5d   :  { %1187 = vmatprep.subr.bf16.mxu0 %v1654_v59  ;;  %v1369_v59 = vcombine.low %v69_v52, %v73_v54  ;;  %v68_v54 = vld [vmem:[#allocation2 + $0xc8] sm:$0xff] }
  0x5f   :  { %1042 = vmatpush1.bf16.msra.mxu1 %v1656_v60  ;;  %v1714_v60 = vld [vmem:[#allocation5 + $0x174] ss:$8 sps:$4 sm:$0xff]  }
  0x60   :  { %1188 = vmatpush1.bf16.msra.mxu0 %v1657_v61  ;;  %1043 = vmatprep.subr.bf16.mxu1 %v1658_v62  ;;  %v1717_v61 = vld [vmem:[#allocation5 + $0x374] ss:$8 sps:$4 sm:$0xff]   ;;  %v1891_v62 = vld [vmem:[#allocation2 + $0x8] sm:$0xff] }
  0x61   :  { %1189 = vmatprep.subr.bf16.mxu0 %v1660_v63  ;;  %v1893_v63 = vld [vmem:[#allocation2 + $0x28] sm:$0xff] }
  0x63   :  { %1044 = vmatpush1.bf16.msra.mxu1 %v1662_v0  ;;  %v1895_v0 = vld [vmem:[#allocation2 + $0x18] sm:$0xff] }
  0x64   :  { %1190 = vmatpush1.bf16.msra.mxu0 %v1663_v1  ;;  %1045 = vmatprep.subr.bf16.mxu1 %v1664_v2  ;;  %v1897_v1 = vld [vmem:[#allocation2 + $0x38] sm:$0xff] }
  0x65   :  { %1191 = vmatprep.subr.bf16.mxu0 %v1666_v3  ;;  %v1712_v2 = vld [vmem:[#allocation5 + $0x170] ss:$8 sps:$4 sm:$0xff]  }
  0x66   :  { %v1715_v3 = vld [vmem:[#allocation5 + $0x370] ss:$8 sps:$4 sm:$0xff]  }
  0x67   :  { %1046 = vmatpush1.bf16.msra.mxu1 %v1668_v4  ;;  %v1344_v4 = vcombine.high %v1891_v62, %v1893_v63 }
  0x68   :  { %1192 = vmatpush1.bf16.msra.mxu0 %v1669_v5  ;;  %1088 = vmatprep.subr.bf16.mxu1 %v1672_v6  ;;  %v1720_v5 = vld [vmem:[#allocation5 + $0x184] ss:$8 sps:$4 sm:$0xff]  }
  0x69   :  { %1234 = vmatprep.subr.bf16.mxu0 %v1675_v7  ;;  %v1723_v6 = vld [vmem:[#allocation5 + $0x384] ss:$8 sps:$4 sm:$0xff]   ;;  %v1348_v7 = vcombine.high %v1895_v0, %v1897_v1 }
  0x6a   :  { %1048 = vmatmul.mubr.bf16.vlgmr.msra.gmra.mrb[0].mxu1 %v1341_v8  ;;  %v1718_v8 = vld [vmem:[#allocation5 + $0x180] ss:$8 sps:$4 sm:$0xff]  }
  0x6b   :  { %1194 = vmatmul.mubr.bf16.vlgmr.msra.gmra.mrb[0].mxu0 %v1345_v10  ;;  %1089 = vmatpush1.bf16.msra.mxu1 %v1670_v9  ;;  %v1721_v9 = vld [vmem:[#allocation5 + $0x380] ss:$8 sps:$4 sm:$0xff]   ;;  %v1726_v10 = vld [vmem:[#allocation5 + $0x194] ss:$8 sps:$4 sm:$0xff]  }
  0x6c   :  { %1235 = vmatpush1.bf16.msra.mxu0 %v1673_v11  ;;  %1090 = vmatprep.subr.bf16.mxu1 %v1678_v12  ;;  %v1729_v11 = vld [vmem:[#allocation5 + $0x394] ss:$8 sps:$4 sm:$0xff]   ;;  %v1724_v12 = vld [vmem:[#allocation5 + $0x190] ss:$8 sps:$4 sm:$0xff]  }
  0x6d   :  { %1236 = vmatprep.subr.bf16.mxu0 %v1681_v13  ;;  %1057 = vmatprep.mubr.bf16.mxu1 %v1350_v25  ;;  %v1727_v13 = vld [vmem:[#allocation5 + $0x390] ss:$8 sps:$4 sm:$0xff]   ;;  %v1745_v25 = vld [vmem:[#allocation5 + $0x3c0] ss:$8 sps:$4 sm:$0xff]  }
  0x6e   :  { %1203 = vmatprep.mubr.bf16.mxu0 %v1354_v26  ;;  %v1750_v26 = vld [vmem:[#allocation5 + $0x1d4] ss:$8 sps:$4 sm:$0xff]  }
  0x6f   :  { %1091 = vmatpush1.bf16.msra.mxu1 %v1676_v14  ;;  %v1732_v14 = vld [vmem:[#allocation5 + $0x1a4] ss:$8 sps:$4 sm:$0xff]  }
  0x70   :  { %1237 = vmatpush1.bf16.msra.mxu0 %v1679_v15  ;;  %1092 = vmatprep.subr.bf16.mxu1 %v1684_v16  ;;  %v1735_v15 = vld [vmem:[#allocation5 + $0x3a4] ss:$8 sps:$4 sm:$0xff]   ;;  %v1730_v16 = vld [vmem:[#allocation5 + $0x1a0] ss:$8 sps:$4 sm:$0xff]  }
  0x71   :  { %1238 = vmatprep.subr.bf16.mxu0 %v1687_v17  ;;  %v1733_v17 = vld [vmem:[#allocation5 + $0x3a0] ss:$8 sps:$4 sm:$0xff]  }
  0x72   :  { %1058 = vmatmul.mubr.bf16.gmra.mrb[4].mxu1 %v1349_v27  ;;  %v1753_v27 = vld [vmem:[#allocation5 + $0x3d4] ss:$8 sps:$4 sm:$0xff]  }
  0x73   :  { %1204 = vmatmul.mubr.bf16.gmra.mrb[4].mxu0 %v1353_v29  ;;  %1093 = vmatpush1.bf16.msra.mxu1 %v1682_v18  ;;  %v1738_v18 = vld [vmem:[#allocation5 + $0x1b4] ss:$8 sps:$4 sm:$0xff]   ;;  %v1751_v29 = vld [vmem:[#allocation5 + $0x3d0] ss:$8 sps:$4 sm:$0xff]  }
  0x74   :  { %1239 = vmatpush1.bf16.msra.mxu0 %v1685_v19  ;;  %1094 = vmatprep.subr.bf16.mxu1 %v1690_v24  ;;  %v1741_v19 = vld [vmem:[#allocation5 + $0x3b4] ss:$8 sps:$4 sm:$0xff]   ;;  %v1742_v24 = vld [vmem:[#allocation5 + $0x1c0] ss:$8 sps:$4 sm:$0xff]  }
  0x75   :  { %1240 = vmatprep.subr.bf16.mxu0 %v1693_v28  ;;  %1067 = vmatprep.mubr.bf16.mxu1 %v1358_v36  ;;  %v1748_v28 = vld [vmem:[#allocation5 + $0x1d0] ss:$8 sps:$4 sm:$0xff]  }
  0x76   :  { %1213 = vmatprep.mubr.bf16.mxu0 %v1362_v41  ;;  %v1760_v36 = vld [vmem:[#allocation5 + $0x1f0] ss:$8 sps:$4 sm:$0xff]  }
  0x77   :  { %1095 = vmatpush1.bf16.msra.mxu1 %v1688_v30  ;;  %v1756_v30 = vld [vmem:[#allocation5 + $0x1e4] ss:$8 sps:$4 sm:$0xff]   ;;  %v58_v41 = vld [vmem:[#allocation2 + $0x78] sm:$0xff] }
  0x78   :  { %1241 = vmatpush1.bf16.msra.mxu0 %v1691_v31  ;;  %1096 = vmatprep.subr.bf16.mxu1 %v1696_v32  ;;  %v1759_v31 = vld [vmem:[#allocation5 + $0x3e4] ss:$8 sps:$4 sm:$0xff]   ;;  %v1754_v32 = vld [vmem:[#allocation5 + $0x1e0] ss:$8 sps:$4 sm:$0xff]  }
  0x79   :  { %1242 = vmatprep.subr.bf16.mxu0 %v1699_v33  ;;  %v1757_v33 = vld [vmem:[#allocation5 + $0x3e0] ss:$8 sps:$4 sm:$0xff]  }
  0x7a   :  { %1068 = vmatmul.mubr.bf16.gmra.mrb[8].mxu1 %v1357_v42  ;;  %v1343_v42 = vcombine.low %v1891_v62, %v1893_v63 }
  0x7b   :  { %1214 = vmatmul.mubr.bf16.gmra.mrb[8].mxu0 %v1361_v43  ;;  %1097 = vmatpush1.bf16.msra.mxu1 %v1694_v39  ;;  %v56_v39 = vld [vmem:[#allocation2 + $0x68] sm:$0xff]  ;;  %v1347_v43 = vcombine.low %v1895_v0, %v1897_v1  ;;  %v205_v0 = vlaneseq }
  0x7c   :  { %1243 = vmatpush1.bf16.msra.mxu0 %v1697_v40  ;;  %1098 = vmatprep.subr.bf16.mxu1 %v1702_v44  ;;  %v54_v40 = vld [vmem:[#allocation2 + $0x58] sm:$0xff]  ;;  %v1352_v44 = vcombine.high %v52_v38, %v56_v39  ;;  %v1351_v50 = vcombine.low %v52_v38, %v56_v39 }
  0x7d   :  { %1244 = vmatprep.subr.bf16.mxu0 %v1705_v45  ;;  %1077 = vmatprep.mubr.bf16.mxu1 %v1366_v53  ;;  %v1356_v45 = vcombine.high %v54_v40, %v58_v41  ;;  %v1355_v51 = vcombine.low %v54_v40, %v58_v41  ;;  %v206_v1 = vshrl.u32 %v205_v0, 7 }
  0x7e   :  { %1223 = vmatprep.mubr.bf16.mxu0 %v1370_v55  ;;  %v72_v55 = vld [vmem:[#allocation2 + $0xe8] sm:$0xff] }
  0x7f   :  { %1099 = vmatpush1.bf16.msra.mxu1 %v1700_v46  ;;  %v60_v46 = vld [vmem:[#allocation2 + $0x88] sm:$0xff]  ;;  %v1367_v62 = vcombine.low %v68_v54, %v72_v55 }
  0x80   :  { %1245 = vmatpush1.bf16.msra.mxu0 %v1703_v47  ;;  %1100 = vmatprep.subr.bf16.mxu1 %v1708_v48  ;;  %v64_v47 = vld [vmem:[#allocation2 + $0xa8] sm:$0xff]  ;;  %v62_v48 = vld [vmem:[#allocation2 + $0x98] sm:$0xff] }
  0x81   :  { %1246 = vmatprep.subr.bf16.mxu0 %v1711_v49  ;;  %v66_v49 = vld [vmem:[#allocation2 + $0xb8] sm:$0xff]  ;;  %v1360_v52 = vcombine.high %v60_v46, %v64_v47 }
  0x82   :  { %1078 = vmatmul.mubr.bf16.gmra.mrb[12].mxu1 %v1365_v58  ;;  %v1364_v53 = vcombine.high %v62_v48, %v66_v49  ;;  %v1359_v58 = vcombine.low %v60_v46, %v64_v47 }
  0x83   :  { %1224 = vmatmul.mubr.bf16.gmra.mrb[12].mxu0 %v1369_v59  ;;  %1101 = vmatpush1.bf16.msra.mxu1 %v1706_v56  ;;  %v70_v56 = vld [vmem:[#allocation2 + $0xd8] sm:$0xff]  ;;  %v1363_v59 = vcombine.low %v62_v48, %v66_v49 }
  0x84   :  { %1247 = vmatpush1.bf16.msra.mxu0 %v1709_v57  ;;  %1102 = vmatprep.subr.bf16.mxu1 %v1714_v60  ;;  %v74_v57 = vld [vmem:[#allocation2 + $0xf8] sm:$0xff]  ;;  %v1368_v60 = vcombine.high %v68_v54, %v72_v55 }
  0x85   :  { %1248 = vmatprep.subr.bf16.mxu0 %v1717_v61  ;;  %1120 = vmatprep.mubr.bf16.mxu1 %v1344_v4  ;;  %v1372_v61 = vcombine.high %v70_v56, %v74_v57  ;;  %v1371_v63 = vcombine.low %v70_v56, %v74_v57  ;;  %v211_v4 = vsub.s32 1, %v206_v1 }
  0x86   :  { %1266 = vmatprep.mubr.bf16.mxu0 %v1348_v7 }
  0x87   :  { %1103 = vmatpush1.bf16.msra.mxu1 %v1712_v2  ;;  %v207_v2 = vsub.s32 0, %v206_v1 }
  0x88   :  { %1249 = vmatpush1.bf16.msra.mxu0 %v1715_v3  ;;  %1104 = vmatprep.subr.bf16.mxu1 %v1720_v5  ;;  %v203_v3 = vld [vmem:[%s1944_s2] sm:$0x3] }
  0x89   :  { %1250 = vmatprep.subr.bf16.mxu0 %v1723_v6  ;;  %v1910_v5 = vrot.slane %v203_v3, %v207_v2  ;;  %v1912_v6 = vrot.slane %v203_v3, %v211_v4 }
  0x8b   :  { %1105 = vmatpush1.bf16.msra.mxu1 %v1718_v8 }
  0x8c   :  { %1251 = vmatpush1.bf16.msra.mxu0 %v1721_v9  ;;  %1106 = vmatprep.subr.bf16.mxu1 %v1726_v10 }
  0x8d   :  { %1252 = vmatprep.subr.bf16.mxu0 %v1729_v11 }
  0x8f   :  { %1107 = vmatpush1.bf16.msra.mxu1 %v1724_v12 }
  0x90   :  { %1253 = vmatpush1.bf16.msra.mxu0 %v1727_v13  ;;  %1108 = vmatprep.subr.bf16.mxu1 %v1732_v14 }
  0x91   :  { %1254 = vmatprep.subr.bf16.mxu0 %v1735_v15 }
  0x93   :  { %1109 = vmatpush1.bf16.msra.mxu1 %v1730_v16 }
  0x94   :  { %1255 = vmatpush1.bf16.msra.mxu0 %v1733_v17  ;;  %1110 = vmatprep.subr.bf16.mxu1 %v1738_v18 }
  0x95   :  { %1256 = vmatprep.subr.bf16.mxu0 %v1741_v19 }
  0x97   :  { %1111 = vmatpush1.bf16.msra.mxu1 %v1736_v20 }
  0x98   :  { %1257 = vmatpush1.bf16.msra.mxu0 %v1739_v21  ;;  %1112 = vmatprep.subr.bf16.mxu1 %v1744_v22 }
  0x99   :  { %1258 = vmatprep.subr.bf16.mxu0 %v1747_v23 }
  0x9b   :  { %1113 = vmatpush1.bf16.msra.mxu1 %v1742_v24 }
  0x9c   :  { %1259 = vmatpush1.bf16.msra.mxu0 %v1745_v25  ;;  %1114 = vmatprep.subr.bf16.mxu1 %v1750_v26 }
  0x9d   :  { %1260 = vmatprep.subr.bf16.mxu0 %v1753_v27 }
  0x9f   :  { %1115 = vmatpush1.bf16.msra.mxu1 %v1748_v28 }
  0xa0   :  { %1261 = vmatpush1.bf16.msra.mxu0 %v1751_v29  ;;  %1116 = vmatprep.subr.bf16.mxu1 %v1756_v30 }
  0xa1   :  { %1262 = vmatprep.subr.bf16.mxu0 %v1759_v31 }
  0xa3   :  { %1117 = vmatpush1.bf16.msra.mxu1 %v1754_v32 }
  0xa4   :  { %1263 = vmatpush1.bf16.msra.mxu0 %v1757_v33  ;;  %1118 = vmatprep.subr.bf16.mxu1 %v1762_v34 }
  0xa5   :  { %1264 = vmatprep.subr.bf16.mxu0 %v1765_v35 }
  0xa7   :  { %1119 = vmatpush1.bf16.msra.mxu1 %v1760_v36 }
  0xa8   :  { %1265 = vmatpush1.bf16.msra.mxu0 %v1763_v37 }
  0xaa   :  { %1121 = vmatmul.mubr.bf16.vlgmr.msra.gmra.mrb[0].mxu1 %v1343_v42 }
  0xab   :  { %1267 = vmatmul.mubr.bf16.vlgmr.msra.gmra.mrb[0].mxu0 %v1347_v43  ;;  %1130 = vmatprep.mubr.bf16.mxu1 %v1352_v44 }
  0xac   :  { %1276 = vmatprep.mubr.bf16.mxu0 %v1356_v45 }
  0xb2   :  { %1131 = vmatmul.mubr.bf16.gmra.mrb[4].mxu1 %v1351_v50 }
  0xb3   :  { %1277 = vmatmul.mubr.bf16.gmra.mrb[4].mxu0 %v1355_v51  ;;  %1140 = vmatprep.mubr.bf16.mxu1 %v1360_v52 }
  0xb4   :  { %1286 = vmatprep.mubr.bf16.mxu0 %v1364_v53 }
  0xba   :  { %1141 = vmatmul.mubr.bf16.gmra.mrb[8].mxu1 %v1359_v58 }
  0xbb   :  { %1287 = vmatmul.mubr.bf16.gmra.mrb[8].mxu0 %v1363_v59  ;;  %1150 = vmatprep.mubr.bf16.mxu1 %v1368_v60 }
  0xbc   :  { %1296 = vmatprep.mubr.bf16.mxu0 %v1372_v61 }
  0xc2   :  { %1151 = vmatmul.mubr.bf16.gmra.mrb[12].mxu1 %v1367_v62 }
  0xc3   :  { %1297 = vmatmul.mubr.bf16.gmra.mrb[12].mxu0 %v1371_v63 }
 0x17d   :  { %v1122_v7 = vpop.f32.mrb[0].mxu1 }
 0x17e   :  { %v1268_v8 = vpop.f32.mrb[0].mxu0  ;;  %v1501_v9 = vadd.f32 %v1122_v7, %v1910_v5  ;;  %v1124_v10 = vpop.f32.mrb[1].mxu1 }
 0x17f   :  { %v1270_v11 = vpop.f32.mrb[1].mxu0  ;;  %v1503_v12 = vadd.f32 %v1124_v10, %v1912_v6  ;;  %v1126_v13 = vpop.f32.mrb[2].mxu1 }
 0x180   :  { %v1272_v14 = vpop.f32.mrb[2].mxu0  ;;  %v1502_v15 = vadd.f32 %v1501_v9, %v1268_v8  ;;  %v1505_v16 = vadd.f32 %v1126_v13, %v1910_v5  ;;  %v1128_v17 = vpop.f32.mrb[3].mxu1 }
 0x181   :  { %v1274_v18 = vpop.f32.mrb[3].mxu0  ;;  %v1504_v19 = vadd.f32 %v1503_v12, %v1270_v11  ;;  %v1507_v20 = vadd.f32 %v1128_v17, %v1912_v6 }
 0x182   :  { %1307 = vst [vmem:[#allocation7] sm:$0xff] %v1502_v15  ;;  %v1506_v21 = vadd.f32 %v1505_v16, %v1272_v14 }
 0x183   :  { %1308 = vst [vmem:[#allocation7 + $0x8] sm:$0xff] %v1504_v19  ;;  %v1508_v22 = vadd.f32 %v1507_v20, %v1274_v18 }
 0x184   :  { %1309 = vst [vmem:[#allocation7 + $0x10] sm:$0xff] %v1506_v21 }
 0x185   :  { %1310 = vst [vmem:[#allocation7 + $0x18] sm:$0xff] %v1508_v22  ;;  %v1132_v23 = vpop.f32.mrb[4].mxu1 }
 0x186   :  { %v1278_v24 = vpop.f32.mrb[4].mxu0  ;;  %v1509_v25 = vadd.f32 %v1132_v23, %v1910_v5  ;;  %v1134_v26 = vpop.f32.mrb[5].mxu1 }
 0x187   :  { %v1280_v27 = vpop.f32.mrb[5].mxu0  ;;  %v1511_v28 = vadd.f32 %v1134_v26, %v1912_v6  ;;  %v1136_v29 = vpop.f32.mrb[6].mxu1 }
 0x188   :  { %v1282_v30 = vpop.f32.mrb[6].mxu0  ;;  %v1510_v31 = vadd.f32 %v1509_v25, %v1278_v24  ;;  %v1513_v32 = vadd.f32 %v1136_v29, %v1910_v5  ;;  %v1138_v33 = vpop.f32.mrb[7].mxu1 }
 0x189   :  { %v1284_v34 = vpop.f32.mrb[7].mxu0  ;;  %v1512_v35 = vadd.f32 %v1511_v28, %v1280_v27  ;;  %v1515_v36 = vadd.f32 %v1138_v33, %v1912_v6 }
 0x18a   :  { %1311 = vst [vmem:[#allocation7 + $0x20] sm:$0xff] %v1510_v31  ;;  %v1514_v37 = vadd.f32 %v1513_v32, %v1282_v30 }
 0x18b   :  { %1312 = vst [vmem:[#allocation7 + $0x28] sm:$0xff] %v1512_v35  ;;  %v1516_v38 = vadd.f32 %v1515_v36, %v1284_v34 }
 0x18c   :  { %1313 = vst [vmem:[#allocation7 + $0x30] sm:$0xff] %v1514_v37 }
 0x18d   :  { %1314 = vst [vmem:[#allocation7 + $0x38] sm:$0xff] %v1516_v38  ;;  %v1142_v39 = vpop.f32.mrb[8].mxu1 }
 0x18e   :  { %v1288_v40 = vpop.f32.mrb[8].mxu0  ;;  %v1517_v41 = vadd.f32 %v1142_v39, %v1910_v5  ;;  %v1144_v42 = vpop.f32.mrb[9].mxu1 }
 0x18f   :  { %v1290_v43 = vpop.f32.mrb[9].mxu0  ;;  %v1519_v44 = vadd.f32 %v1144_v42, %v1912_v6  ;;  %v1146_v45 = vpop.f32.mrb[10].mxu1 }
 0x190   :  { %v1292_v46 = vpop.f32.mrb[10].mxu0  ;;  %v1518_v47 = vadd.f32 %v1517_v41, %v1288_v40  ;;  %v1521_v48 = vadd.f32 %v1146_v45, %v1910_v5  ;;  %v1148_v49 = vpop.f32.mrb[11].mxu1 }
 0x191   :  { %v1294_v50 = vpop.f32.mrb[11].mxu0  ;;  %v1520_v51 = vadd.f32 %v1519_v44, %v1290_v43  ;;  %v1523_v52 = vadd.f32 %v1148_v49, %v1912_v6 }
 0x192   :  { %1315 = vst [vmem:[#allocation7 + $0x40] sm:$0xff] %v1518_v47  ;;  %v1522_v53 = vadd.f32 %v1521_v48, %v1292_v46 }
 0x193   :  { %1316 = vst [vmem:[#allocation7 + $0x48] sm:$0xff] %v1520_v51  ;;  %v1524_v54 = vadd.f32 %v1523_v52, %v1294_v50 }
 0x194   :  { %1317 = vst [vmem:[#allocation7 + $0x50] sm:$0xff] %v1522_v53 }
 0x195   :  { %1318 = vst [vmem:[#allocation7 + $0x58] sm:$0xff] %v1524_v54  ;;  %v1152_v55 = vpop.f32.mrb[12].mxu1 }
 0x196   :  { %v1298_v56 = vpop.f32.mrb[12].mxu0  ;;  %v1525_v57 = vadd.f32 %v1152_v55, %v1910_v5  ;;  %v1154_v58 = vpop.f32.mrb[13].mxu1 }
 0x197   :  { %v1300_v59 = vpop.f32.mrb[13].mxu0  ;;  %v1527_v60 = vadd.f32 %v1154_v58, %v1912_v6  ;;  %v1156_v61 = vpop.f32.mrb[14].mxu1 }
 0x198   :  { %v1302_v62 = vpop.f32.mrb[14].mxu0  ;;  %v1526_v63 = vadd.f32 %v1525_v57, %v1298_v56  ;;  %v1529_v0 = vadd.f32 %v1156_v61, %v1910_v5  ;;  %v1158_v1 = vpop.f32.mrb[15].mxu1 }
 0x199   :  { %v1304_v2 = vpop.f32.mrb[15].mxu0  ;;  %v1528_v3 = vadd.f32 %v1527_v60, %v1300_v59  ;;  %v1531_v4 = vadd.f32 %v1158_v1, %v1912_v6 }
 0x19a   :  { %1319 = vst [vmem:[#allocation7 + $0x60] sm:$0xff] %v1526_v63  ;;  %v1530_v7 = vadd.f32 %v1529_v0, %v1302_v62 }
 0x19b   :  { %1320 = vst [vmem:[#allocation7 + $0x68] sm:$0xff] %v1528_v3  ;;  %v1532_v8 = vadd.f32 %v1531_v4, %v1304_v2 }
 0x19c   :  { %1321 = vst [vmem:[#allocation7 + $0x70] sm:$0xff] %v1530_v7 }
 0x19d   :  { %1322 = vst [vmem:[#allocation7 + $0x78] sm:$0xff] %v1532_v8 }
 0x19e   :  { %1327 = vsyncadd [#allocation4], 256  ;;  %s1844_s2 = smov [#allocation7]  }
 0x19f   :  { %s1328_s14 = sshll.u32 %s1844_s2, 4  ;;  %s1329_s14 = int_to_ptr.vmem [resolvable:$true] %s1328_s14 }
 0x1a0   :  { %s1810_s15 = scalar_lea.vmem %s1329_s14, 1792  ;;  %s1814_s16 = scalar_lea.vmem %s1329_s14, 2048 }
 0x1a1   :  { %p1811_p2 = scmp.ne.s32.totalorder %s1329_s14, %s1810_s15  ;;  %p1815_p3 = scmp.lt.s32.totalorder %s1329_s14, %s1329_s14 }
 0x1a2   :  { %p1816_p4 = scmp.lt.s32.totalorder %s1814_s16, %s1810_s15 }
 0x1a4   :  { %p1817_p5 = por %p1816_p4, %p1815_p3 }
 0x1a6   :  { %p1818_p6 = pnand %p1817_p5, %p1811_p2 }
 0x1a8   :  { %1821 = shalt.err (!%p1818_p6)
}
 0x1a9   :  { %s1822_s19 = scalar_lea.hbm %s1945_s3, 1792 }
 0x1aa   :  { %p1823_p7 = scmp.ne.s32.totalorder %s1945_s3, %s1822_s19  ;;  %p1826_p8 = scmp.lt.u32.totalorder %s1822_s19, %s1945_s3 }
 0x1ac   :  { %p1828_p9 = pnand %p1826_p8, %p1823_p7 }
 0x1ae   :  { %1831 = shalt.err (!%p1828_p9)
}
 0x1af   :  { %s1845_s24 = smov 256   ;;  %s1846_s25 = smov 16  }
 0x1b0   :  { %1334 = dma.vmem_to_hbm [thread:$0]  %s1329_s14, 1792, %s1945_s3, [#allocation4], %s1845_s24, %s1845_s24, %s1846_s25  }
 0x1b1   :  { %1836 = dma.done.wait [#allocation4], 2048  }
 0x1b2   :  { %1837 = vsyncadd [#allocation4], 4294965248 }
 0x1b3   :  { %1338 = vsyncpa [#allocation3], 1 }
 0x1b4   :  { %1339 = vsyncpa [#allocation6], 1 }
 0x1b5   :  { %1340 = vsyncpa [#allocation4], 1 }

</bundles_post_ra>
